<compile_context>
chip_gen: v7x
topology: tpu7x:2x2x1
jax: 0.10.0
libtpu: 0.0.40
codegen_flags: <defaults>
</compile_context>

<pallas_src>
import functools

import jax
import jax.numpy as jnp
from jax.experimental import pallas as pl
from jax.experimental.pallas import tpu as pltpu


def _rup(x, m):
    return ((x + m - 1) // m) * m


def _split_dim(extent, gran, cap):
    """Balanced tiling: returns (tile, padded_extent); tile % gran == 0."""
    if extent <= cap:
        t = max(gran, _rup(extent, gran))
        return t, t
    n = -(-extent // cap)                    # number of tiles
    t = _rup(-(-extent // n), gran)
    return t, n * t


def _split_k(K0, cap=512, single_max=640):
    """K tiling.  Small K: one full-dim block (exempt from the 128-lane rule).
    Large K: largest 128-multiple <= cap that divides the 128-rounded K."""
    if K0 <= single_max:
        t = _rup(K0, 16)
        return t, t
    Kp = _rup(K0, 128)
    nblocks = Kp // 128
    tk = 128
    for m in range(cap // 128, 0, -1):
        if nblocks % m == 0:
            tk = m * 128
            break
    Kpad = _rup(Kp, tk)
    return tk, Kpad


# ----------------------------------------------------------------------------
# Pallas kernel: M/N/K-tiled GEMM.  bf16 A/B on the MXU, f32 scratch
# accumulator, epilogue = bias add [+ residual] [+ ReLU], bf16 output.
# ----------------------------------------------------------------------------
def _make_mm_kernel(relu, has_res):
    if has_res:
        def kernel(a_ref, b_ref, c_ref, r_ref, o_ref, acc_ref):
            k = pl.program_id(2)

            @pl.when(k == 0)
            def _():
                acc_ref[...] = jnp.zeros_like(acc_ref)

            acc_ref[...] += jnp.dot(a_ref[...], b_ref[...],
                                    preferred_element_type=jnp.float32)

            @pl.when(k == pl.num_programs(2) - 1)
            def _():
                y = acc_ref[...] + c_ref[...]
                y = y + r_ref[...].astype(jnp.float32)
                if relu:
                    y = jnp.maximum(y, 0.0)
                o_ref[...] = y.astype(o_ref.dtype)
    else:
        def kernel(a_ref, b_ref, c_ref, o_ref, acc_ref):
            k = pl.program_id(2)

            @pl.when(k == 0)
            def _():
                acc_ref[...] = jnp.zeros_like(acc_ref)

            acc_ref[...] += jnp.dot(a_ref[...], b_ref[...],
                                    preferred_element_type=jnp.float32)

            @pl.when(k == pl.num_programs(2) - 1)
            def _():
                y = acc_ref[...] + c_ref[...]
                if relu:
                    y = jnp.maximum(y, 0.0)
                o_ref[...] = y.astype(o_ref.dtype)
    return kernel


@functools.lru_cache(maxsize=None)
def _get_matmul_call(M, K, N, TM, TK, TN, relu, has_res):
    kernel = _make_mm_kernel(relu, has_res)
    in_specs = [
        pl.BlockSpec((TM, TK), lambda i, j, k: (i, k)),   # A tile (bf16)
        pl.BlockSpec((TK, TN), lambda i, j, k: (k, j)),   # B tile (bf16)
        pl.BlockSpec((1, TN), lambda i, j, k: (0, j)),    # bias   (f32)
    ]
    if has_res:
        in_specs.append(pl.BlockSpec((TM, TN), lambda i, j, k: (i, j)))  # bf16
    return pl.pallas_call(
        kernel,
        out_shape=jax.ShapeDtypeStruct((M, N), jnp.bfloat16),
        grid_spec=pltpu.PrefetchScalarGridSpec(
            num_scalar_prefetch=0,
            grid=(M // TM, N // TN, K // TK),
            in_specs=in_specs,
            out_specs=pl.BlockSpec((TM, TN), lambda i, j, k: (i, j)),
            scratch_shapes=[pltpu.VMEM((TM, TN), jnp.float32)],
        ),
        compiler_params=pltpu.CompilerParams(
            dimension_semantics=("parallel", "parallel", "arbitrary"),
        ),
    )


def matmul_bias_act(a, b, bias, residual=None, relu=True):
    """(M0,K0) @ (K0,N0) + bias [+ residual] [relu] -> bf16, via Pallas."""
    M0, K0 = a.shape
    _, N0 = b.shape
    TM, M = _split_dim(M0, 16, 1024)
    TN, N = _split_dim(N0, 128, 256)
    TK, K = _split_k(K0)
    # Cast to bf16 BEFORE padding (single pass; no-op if already bf16).
    a_p = jnp.pad(a.astype(jnp.bfloat16), ((0, M - M0), (0, K - K0)))
    b_p = jnp.pad(b.astype(jnp.bfloat16), ((0, K - K0), (0, N - N0)))
    c_p = jnp.pad(bias.reshape(1, -1).astype(jnp.float32),
                  ((0, 0), (0, N - N0)))
    args = [a_p, b_p, c_p]
    if residual is not None:
        args.append(jnp.pad(residual.astype(jnp.bfloat16),
                            ((0, M - M0), (0, N - N0))))
    fn = _get_matmul_call(M, K, N, TM, TK, TN, bool(relu), residual is not None)
    out = fn(*args)
    return out[:M0, :N0]


# ----------------------------------------------------------------------------
# Pallas kernel: 3-way elementwise max (used twice for separable 3x3/s2 pool).
# ----------------------------------------------------------------------------
def _max3_kernel(t0, t1, t2, o_ref):
    o_ref[...] = jnp.maximum(jnp.maximum(t0[...], t1[...]), t2[...])


@functools.lru_cache(maxsize=None)
def _get_max3_call(Mpad, TMP, Cpad, dtype_name):
    dt = jnp.dtype(dtype_name)
    tap_spec = pl.BlockSpec((TMP, Cpad), lambda i: (i, 0))
    return pl.pallas_call(
        _max3_kernel,
        out_shape=jax.ShapeDtypeStruct((Mpad, Cpad), dt),
        grid_spec=pltpu.PrefetchScalarGridSpec(
            num_scalar_prefetch=0,
            grid=(Mpad // TMP,),
            in_specs=[tap_spec] * 3,
            out_specs=pl.BlockSpec((TMP, Cpad), lambda i: (i, 0)),
        ),
        compiler_params=pltpu.CompilerParams(
            dimension_semantics=("parallel",)),
    )


def _max3_rows(t0, t1, t2):
    """Elementwise max of three (M0, C) arrays (same dtype)."""
    M0, C = t0.shape
    TMP, Mpad = _split_dim(M0, 16, 1024)
    Cpad = _rup(C, 128)
    neg = float(jnp.finfo(t0.dtype).min)

    def _padt(t):
        return jnp.pad(t, ((0, Mpad - M0), (0, Cpad - C)),
                       constant_values=neg)

    out = _get_max3_call(Mpad, TMP, Cpad, str(t0.dtype))(
        _padt(t0), _padt(t1), _padt(t2))
    return out[:M0, :C]


def maxpool2d_3x3_s2(x):
    """x: NHWC (bf16) -> NHWC, kernel 3, stride 2, padding 1 (ResNet stem pool).

    Separable: 3-tap max along W, then 3-tap max along H (reads ~2-3x instead
    of 9x).  Pad value is the dtype min (not -inf); every valid window contains
    at least one real element, so it never leaks into the output.
    """
    B, H, W, C = x.shape
    Ho = (H + 2 - 3) // 2 + 1
    Wo = (W + 2 - 3) // 2 + 1
    neg = float(jnp.finfo(x.dtype).min)
    xp = jnp.pad(x, ((0, 0), (1, 1), (1, 1), (0, 0)), constant_values=neg)
    Hp = H + 2

    # Pass 1: reduce along W with stride 2 (for all padded rows).
    w_taps = [xp[:, :, dx:dx + 2 * Wo:2, :].reshape(B * Hp * Wo, C)
              for dx in range(3)]
    colmax = _max3_rows(*w_taps).reshape(B, Hp, Wo, C)

    # Pass 2: reduce along H with stride 2.
    h_taps = [colmax[:, dy:dy + 2 * Ho:2, :, :].reshape(B * Ho * Wo, C)
              for dy in range(3)]
    out = _max3_rows(*h_taps).reshape(B, Ho, Wo, C)
    return out


# ----------------------------------------------------------------------------
# Conv(+folded-BN+ReLU[+residual]) as im2col GEMM.
# ----------------------------------------------------------------------------
def conv_bn_act(x, p, stride, padding, relu=True, residual=None):
    """x: NHWC bf16.  p['w']: [kh,kw,Cin,Cout] with BN scale already folded in;
    p['bias']: [Cout] folded BN bias."""
    B, H, W, Cin = x.shape
    kh, kw, _, Cout = p["w"].shape
    xp = jnp.pad(x, ((0, 0), (padding, padding), (padding, padding), (0, 0)))
    Ho = (H + 2 * padding - kh) // stride + 1
    Wo = (W + 2 * padding - kw) // stride + 1
    if kh == 1 and kw == 1 and padding == 0:
        a = xp[:, ::stride, ::stride, :].reshape(B * Ho * Wo, Cin)
    else:
        # TODO(synk): stream these taps through the GEMM grid instead of
        # materializing the full im2col matrix in HBM.
        cols = []
        for dy in range(kh):
            for dx in range(kw):
                cols.append(xp[:, dy:dy + stride * Ho:stride,
                               dx:dx + stride * Wo:stride, :])
        a = jnp.concatenate(cols, axis=-1).reshape(B * Ho * Wo, kh * kw * Cin)
    bmat = p["w"].reshape(kh * kw * Cin, Cout)
    res_flat = None
    if residual is not None:
        res_flat = residual.reshape(B * Ho * Wo, Cout)
    out = matmul_bias_act(a, bmat, p["bias"], residual=res_flat, relu=relu)
    return out.reshape(B, Ho, Wo, Cout)


# ----------------------------------------------------------------------------
# Deterministic synthetic ResNet-50 encoder parameters (BN folded at prep).
# ----------------------------------------------------------------------------
class _ParamGen:
    def __init__(self, key):
        self.key = key
        self.i = 0

    def _next(self):
        k = jax.random.fold_in(self.key, self.i)
        self.i += 1
        return k

    def conv_bn(self, kh, kw, cin, cout):
        fan_in = kh * kw * cin
        w = jax.random.normal(self._next(), (kh, kw, cin, cout),
                              jnp.float32) * (2.0 / fan_in) ** 0.5
        gamma = jax.random.uniform(self._next(), (cout,), jnp.float32, 0.5, 1.5)
        beta = jax.random.normal(self._next(), (cout,), jnp.float32) * 0.1
        mean = jax.random.normal(self._next(), (cout,), jnp.float32) * 0.1
        var = jax.random.uniform(self._next(), (cout,), jnp.float32, 0.5, 1.5)
        eps = 1e-5
        scale = gamma / jnp.sqrt(var + eps)
        bias = beta - mean * scale
        # Fold eval-mode BN scale directly into the conv weights.
        return {"w": w * scale, "bias": bias}


def make_resnet50_encoder_params(key):
    g = _ParamGen(key)
    params = {"stem": g.conv_bn(7, 7, 3, 64)}
    layers = []
    inplanes = 64
    # (planes, num_blocks, stride) — torchvision resnet50
    for planes, nblocks, stride in [(64, 3, 1), (128, 4, 2),
                                    (256, 6, 2), (512, 3, 2)]:
        blocks = []
        for b in range(nblocks):
            s = stride if b == 0 else 1
            block = {
                "stride": s,
                "conv1": g.conv_bn(1, 1, inplanes, planes),
                "conv2": g.conv_bn(3, 3, planes, planes),
                "conv3": g.conv_bn(1, 1, planes, planes * 4),
            }
            if b == 0:
                block["down"] = g.conv_bn(1, 1, inplanes, planes * 4)
            blocks.append(block)
            inplanes = planes * 4
        layers.append(blocks)
    params["layers"] = layers
    return params


# ----------------------------------------------------------------------------
# Forward pass of `resnet` (resnet50 without avgpool / fc).
# ----------------------------------------------------------------------------
def _bottleneck(x, block):
    s = block["stride"]
    if "down" in block:
        identity = conv_bn_act(x, block["down"], stride=s, padding=0,
                               relu=False)
    else:
        identity = x
    out = conv_bn_act(x, block["conv1"], stride=1, padding=0, relu=True)
    out = conv_bn_act(out, block["conv2"], stride=s, padding=1, relu=True)
    out = conv_bn_act(out, block["conv3"], stride=1, padding=0, relu=True,
                      residual=identity)
    return out


def resnet_encoder_forward(x_nchw, params):
    # NCHW -> NHWC, bf16 activations end-to-end (accumulation stays f32).
    x = jnp.transpose(x_nchw, (0, 2, 3, 1)).astype(jnp.bfloat16)
    x = conv_bn_act(x, params["stem"], stride=2, padding=3, relu=True)
    x = maxpool2d_3x3_s2(x)
    for blocks in params["layers"]:
        for block in blocks:
            x = _bottleneck(x, block)
    # NHWC -> NCHW, f32 like the PyTorch module's output.
    return jnp.transpose(x, (0, 3, 1, 2)).astype(jnp.float32)


if __name__ == "__main__":
    key = jax.random.PRNGKey(0)
    x_key, p_key = jax.random.split(key)

    # Small input consistent with the module's NCHW 3-channel image input.
    x = jax.random.normal(x_key, (2, 3, 32, 32), jnp.float32)
    params = make_resnet50_encoder_params(p_key)

    y = resnet_encoder_forward(x, params)
    y = jax.block_until_ready(y)

    # resnet50 encoder: spatial /32, 2048 channels.
    assert y.shape == (2, 2048, 1, 1), y.shape
    assert y.dtype == jnp.float32
    assert bool(jnp.all(jnp.isfinite(y)))
    print("KERNEL_OK")
</pallas_src>

<mosaic_0001>
module attributes {stable_mosaic.version = 11 : i64} {
  func.func @kernel(%arg0: i32, %arg1: i32, %arg2: i32, %arg3: memref<512x160xbf16, #tpu.memory_space<vmem>>, %arg4: memref<160x128xbf16, #tpu.memory_space<vmem>>, %arg5: memref<1x128xf32, #tpu.memory_space<vmem>>, %arg6: memref<512x128xbf16, #tpu.memory_space<vmem>>, %arg7: memref<512x128xf32, #tpu.memory_space<vmem>>) attributes {dimension_semantics = [#tpu.dimension_semantics<parallel>, #tpu.dimension_semantics<parallel>, #tpu.dimension_semantics<arbitrary>], iteration_bounds = array<i64: 1, 1, 1>, scalar_prefetch = 0 : i64, scratch_operands = 1 : i64, tpu.core_type = #tpu.core_type<tc>, window_params = [{transform_indices = @transform_0, window_bounds = array<i64: 512, 160>}, {transform_indices = @transform_1, window_bounds = array<i64: 160, 128>}, {transform_indices = @transform_2, window_bounds = array<i64: 1, 128>}, {transform_indices = @transform_3, window_bounds = array<i64: 512, 128>}]} {
    %c0_i32 = arith.constant 0 : i32
    %0 = arith.cmpi eq, %arg2, %c0_i32 : i32
    %1 = arith.extui %0 : i1 to i32
    %c0_i32_0 = arith.constant 0 : i32
    %2 = arith.cmpi ne, %1, %c0_i32_0 : i32
    scf.if %2 {
      %cst_10 = arith.constant 0.000000e+00 : f32
      %12 = vector.broadcast %cst_10 : f32 to vector<512x128xf32>
      %c0_11 = arith.constant 0 : index
      %c0_12 = arith.constant 0 : index
      %13 = vector.load %arg7[%c0_11, %c0_12] : memref<512x128xf32, #tpu.memory_space<vmem>>, vector<512x128xf32>
      tpu.vector_store %arg7[%c0_11, %c0_12], %12 {strides = array<i32>} : memref<512x128xf32, #tpu.memory_space<vmem>>, vector<512x128xf32>,
    } else {
    }
    %c0 = arith.constant 0 : index
    %c0_1 = arith.constant 0 : index
    %3 = vector.load %arg7[%c0, %c0_1] : memref<512x128xf32, #tpu.memory_space<vmem>>, vector<512x128xf32>
    %c0_2 = arith.constant 0 : index
    %c0_3 = arith.constant 0 : index
    %4 = vector.load %arg3[%c0_2, %c0_3] : memref<512x160xbf16, #tpu.memory_space<vmem>>, vector<512x160xbf16>
    %c0_4 = arith.constant 0 : index
    %c0_5 = arith.constant 0 : index
    %5 = vector.load %arg4[%c0_4, %c0_5] : memref<160x128xbf16, #tpu.memory_space<vmem>>, vector<160x128xbf16>
    %cst = arith.constant dense<0.000000e+00> : vector<512x128xf32>
    %6 = tpu.matmul %4, %5, %cst {dimension_numbers = #tpu.dot_dimension_numbers<[1], [0], [0], [1], [0, 0, 1, 1], [], []>} : vector<512x160xbf16>, vector<160x128xbf16>, vector<512x128xf32> -> vector<512x128xf32>
    %7 = arith.addf %3, %6 : vector<512x128xf32>
    %c0_6 = arith.constant 0 : index
    %c0_7 = arith.constant 0 : index
    %8 = vector.load %arg7[%c0_6, %c0_7] : memref<512x128xf32, #tpu.memory_space<vmem>>, vector<512x128xf32>
    tpu.vector_store %arg7[%c0_6, %c0_7], %7 {strides = array<i32>} : memref<512x128xf32, #tpu.memory_space<vmem>>, vector<512x128xf32>,
    %c0_i32_8 = arith.constant 0 : i32
    %9 = arith.cmpi eq, %arg2, %c0_i32_8 : i32
    %10 = arith.extui %9 : i1 to i32
    %c0_i32_9 = arith.constant 0 : i32
    %11 = arith.cmpi ne, %10, %c0_i32_9 : i32
    scf.if %11 {
      %c0_10 = arith.constant 0 : index
      %c0_11 = arith.constant 0 : index
      %12 = vector.load %arg7[%c0_10, %c0_11] : memref<512x128xf32, #tpu.memory_space<vmem>>, vector<512x128xf32>
      %c0_12 = arith.constant 0 : index
      %c0_13 = arith.constant 0 : index
      %13 = vector.load %arg5[%c0_12, %c0_13] : memref<1x128xf32, #tpu.memory_space<vmem>>, vector<1x128xf32>
      %14 = vector.broadcast %13 : vector<1x128xf32> to vector<512x128xf32>
      %15 = arith.addf %12, %14 : vector<512x128xf32>
      %cst_14 = arith.constant 0.000000e+00 : f32
      %16 = vector.broadcast %cst_14 : f32 to vector<512x128xf32>
      %17 = arith.maximumf %15, %16 : vector<512x128xf32>
      %18 = arith.truncf %17 : vector<512x128xf32> to vector<512x128xbf16>
      %c0_15 = arith.constant 0 : index
      %c0_16 = arith.constant 0 : index
      %19 = vector.load %arg6[%c0_15, %c0_16] : memref<512x128xbf16, #tpu.memory_space<vmem>>, vector<512x128xbf16>
      tpu.vector_store %arg6[%c0_15, %c0_16], %18 {strides = array<i32>} : memref<512x128xbf16, #tpu.memory_space<vmem>>, vector<512x128xbf16>,
    } else {
    }
    return
  }
  func.func @transform_0(%arg0: i32, %arg1: i32, %arg2: i32) -> (i32, i32) {
    %c0_i32 = arith.constant 0 : i32
    return %arg0, %arg2 : i32, i32
  }
  func.func @transform_1(%arg0: i32, %arg1: i32, %arg2: i32) -> (i32, i32) {
    %c0_i32 = arith.constant 0 : i32
    return %arg2, %arg1 : i32, i32
  }
  func.func @transform_2(%arg0: i32, %arg1: i32, %arg2: i32) -> (i32, i32) {
    %c0_i32 = arith.constant 0 : i32
    %c0_i32_0 = arith.constant 0 : i32
    return %c0_i32, %arg1 : i32, i32
  }
  func.func @transform_3(%arg0: i32, %arg1: i32, %arg2: i32) -> (i32, i32) {
    %c0_i32 = arith.constant 0 : i32
    return %arg0, %arg1 : i32, i32
  }
}

</mosaic_0001>

<bundles_post_ra>
// kernel: tpu_custom_call.1
= control target key start
LH: loop header
LB: loop body
LE: loop exit
PB: predicated region body
PF: predicated region fallthrough
CT: control target
= control target key end

     0   :  { %v2212_v1 = vmov 0   ;;  %vm580_vm0 = vcmask 261120   ;;  %s2571_s0 = inlined_call_operand.vmem [shape: bf16[512,160], index: 0, kind: input, shape index: {}]   ;;  %s2572_s1 = inlined_call_operand.vmem [shape: bf16[160,128], index: 1, kind: input, shape index: {}]   ;;  %s2573_s2 = inlined_call_operand.vmem [shape: f32[1,128], index: 2, kind: input, shape index: {}]   ;;  %s2574_s3 = inlined_call_operand.hbm [shape: bf16[512,128], index: 3, kind: output, shape index: {}]  }
   0x1   :  { %v2082_v0 = vld [vmem:[%s2572_s1] sm:$0xff]   ;;  %677 = vmatprep.subr.bf16.mxu0 %v2212_v1  ;;  %2058 = vmatprep.subr.bf16.mxu1 %v2212_v1  ;;  %v2083_v2 = vld [vmem:[%s2572_s1 + $0x8] sm:$0xff]   ;;  %v2084_v3 = vld [vmem:[%s2572_s1 + $0x10] sm:$0xff]  }
   0x2   :  { %678 = vmatpush1.bf16.msra.mxu0 %v2082_v0  ;;  %2068 = vmatpush1.bf16.msra.mxu1 %v2082_v0  ;;  %v2085_v4 = vld [vmem:[%s2572_s1 + $0x18] sm:$0xff]   ;;  %v2094_v5 = vld [vmem:[%s2571_s0 + $0x4] ss:$8 sps:$4 sm:$0xff]   ;;  %v2088_v9 = vld [vmem:[%s2572_s1 + $0x30] sm:$0xff]  }
   0x3   :  { %679 = vmatprep.subr.bf16.mxu0 %v2212_v1  ;;  %2059 = vmatprep.subr.bf16.mxu1 %v2212_v1  ;;  %v2097_v6 = vld [vmem:[%s2571_s0 + $0x104] ss:$8 sps:$4 sm:$0xff]   ;;  %v2089_v10 = vld [vmem:[%s2572_s1 + $0x38] sm:$0xff]   ;;  %v2092_v13 = vld [vmem:[%s2571_s0] ss:$8 sps:$4 sm:$0xff]  }
   0x4   :  { %1706 = vmatprep.mubr.msk.bf16.mxu0 %vm580_vm0, %v2094_v5  ;;  %v2086_v7 = vld [vmem:[%s2572_s1 + $0x20] sm:$0xff]   ;;  %1722 = vmatprep.mubr.msk.bf16.mxu1 %vm580_vm0, %v2097_v6  ;;  %v2087_v8 = vld [vmem:[%s2572_s1 + $0x28] sm:$0xff]   ;;  %v2098_v15 = vld [vmem:[%s2571_s0 + $0x14] ss:$8 sps:$4 sm:$0xff]  }
   0x5   :  { %v2090_v11 = vld [vmem:[%s2572_s1 + $0x40] sm:$0xff]   ;;  %v2091_v12 = vld [vmem:[%s2572_s1 + $0x48] sm:$0xff]   ;;  %v2100_v16 = vld [vmem:[%s2571_s0 + $0x114] ss:$8 sps:$4 sm:$0xff]  }
   0x6   :  { %680 = vmatpush1.bf16.msra.mxu0 %v2083_v2  ;;  %2069 = vmatpush1.bf16.msra.mxu1 %v2083_v2  ;;  %v2095_v14 = vld [vmem:[%s2571_s0 + $0x100] ss:$8 sps:$4 sm:$0xff]   ;;  %v2102_v17 = vld [vmem:[%s2571_s0 + $0x10] ss:$8 sps:$4 sm:$0xff]   ;;  %v2104_v19 = vld [vmem:[%s2571_s0 + $0x24] ss:$8 sps:$4 sm:$0xff]  }
   0x7   :  { %681 = vmatprep.subr.bf16.mxu0 %v2212_v1  ;;  %2060 = vmatprep.subr.bf16.mxu1 %v2212_v1  ;;  %v2103_v18 = vld [vmem:[%s2571_s0 + $0x110] ss:$8 sps:$4 sm:$0xff]   ;;  %v2106_v20 = vld [vmem:[%s2571_s0 + $0x124] ss:$8 sps:$4 sm:$0xff]  }
   0xa   :  { %682 = vmatpush1.bf16.msra.mxu0 %v2084_v3  ;;  %2070 = vmatpush1.bf16.msra.mxu1 %v2084_v3 }
   0xb   :  { %683 = vmatprep.subr.bf16.mxu0 %v2212_v1  ;;  %2061 = vmatprep.subr.bf16.mxu1 %v2212_v1 }
   0xe   :  { %684 = vmatpush1.bf16.msra.mxu0 %v2085_v4  ;;  %2071 = vmatpush1.bf16.msra.mxu1 %v2085_v4 }
   0xf   :  { %685 = vmatprep.subr.bf16.mxu0 %v2212_v1  ;;  %2062 = vmatprep.subr.bf16.mxu1 %v2212_v1 }
  0x12   :  { %686 = vmatpush1.bf16.msra.mxu0 %v2086_v7  ;;  %2072 = vmatpush1.bf16.msra.mxu1 %v2086_v7 }
  0x13   :  { %687 = vmatprep.subr.bf16.mxu0 %v2212_v1  ;;  %2063 = vmatprep.subr.bf16.mxu1 %v2212_v1 }
  0x16   :  { %688 = vmatpush1.bf16.msra.mxu0 %v2087_v8  ;;  %2073 = vmatpush1.bf16.msra.mxu1 %v2087_v8 }
  0x17   :  { %689 = vmatprep.subr.bf16.mxu0 %v2212_v1  ;;  %2064 = vmatprep.subr.bf16.mxu1 %v2212_v1 }
  0x1a   :  { %690 = vmatpush1.bf16.msra.mxu0 %v2088_v9  ;;  %2074 = vmatpush1.bf16.msra.mxu1 %v2088_v9 }
  0x1b   :  { %691 = vmatprep.subr.bf16.mxu0 %v2212_v1  ;;  %2065 = vmatprep.subr.bf16.mxu1 %v2212_v1 }
  0x1e   :  { %692 = vmatpush1.bf16.msra.mxu0 %v2089_v10  ;;  %2075 = vmatpush1.bf16.msra.mxu1 %v2089_v10 }
  0x1f   :  { %693 = vmatprep.subr.bf16.mxu0 %v2212_v1  ;;  %2066 = vmatprep.subr.bf16.mxu1 %v2212_v1 }
  0x22   :  { %694 = vmatpush1.bf16.msra.mxu0 %v2090_v11  ;;  %2076 = vmatpush1.bf16.msra.mxu1 %v2090_v11 }
  0x23   :  { %695 = vmatprep.subr.bf16.mxu0 %v2212_v1  ;;  %2067 = vmatprep.subr.bf16.mxu1 %v2212_v1 }
  0x26   :  { %696 = vmatpush1.bf16.msra.mxu0 %v2091_v12  ;;  %2077 = vmatpush1.bf16.msra.mxu1 %v2091_v12 }
  0x29   :  { %710 = vmatmul.mubr.bf16.vlgmr.msra.gmra.mrb[0].mxu0 %v2092_v13  ;;  %838 = vmatmul.mubr.bf16.vlgmr.msra.gmra.mrb[0].mxu1 %v2095_v14 }
  0x2a   :  { %1707 = vmatprep.mubr.msk.bf16.mxu0 %vm580_vm0, %v2098_v15  ;;  %1723 = vmatprep.mubr.msk.bf16.mxu1 %vm580_vm0, %v2100_v16 }
  0x31   :  { %718 = vmatmul.mubr.bf16.gmra.mrb[4].mxu0 %v2102_v17  ;;  %846 = vmatmul.mubr.bf16.gmra.mrb[4].mxu1 %v2103_v18 }
  0x32   :  { %1708 = vmatprep.mubr.msk.bf16.mxu0 %vm580_vm0, %v2104_v19  ;;  %1724 = vmatprep.mubr.msk.bf16.mxu1 %vm580_vm0, %v2106_v20 }
  0x33   :  { %8 = vsyncpa [#allocation4], 0  ;;  %v2108_v21 = vld [vmem:[%s2571_s0 + $0x20] ss:$8 sps:$4 sm:$0xff]   ;;  %v2110_v23 = vld [vmem:[%s2571_s0 + $0x34] ss:$8 sps:$4 sm:$0xff]  }
  0x34   :  { %v2109_v22 = vld [vmem:[%s2571_s0 + $0x120] ss:$8 sps:$4 sm:$0xff]   ;;  %v2112_v24 = vld [vmem:[%s2571_s0 + $0x134] ss:$8 sps:$4 sm:$0xff]   ;;  %v2114_v25 = vld [vmem:[%s2571_s0 + $0x30] ss:$8 sps:$4 sm:$0xff]  }
  0x35   :  { %v2115_v26 = vld [vmem:[%s2571_s0 + $0x130] ss:$8 sps:$4 sm:$0xff]   ;;  %v2116_v27 = vld [vmem:[%s2571_s0 + $0x44] ss:$8 sps:$4 sm:$0xff]   ;;  %v2120_v29 = vld [vmem:[%s2571_s0 + $0x40] ss:$8 sps:$4 sm:$0xff]  }
  0x36   :  { %v2118_v28 = vld [vmem:[%s2571_s0 + $0x144] ss:$8 sps:$4 sm:$0xff]   ;;  %v2121_v30 = vld [vmem:[%s2571_s0 + $0x140] ss:$8 sps:$4 sm:$0xff]   ;;  %v2122_v31 = vld [vmem:[%s2571_s0 + $0x54] ss:$8 sps:$4 sm:$0xff]  }
  0x37   :  { %v2124_v32 = vld [vmem:[%s2571_s0 + $0x154] ss:$8 sps:$4 sm:$0xff]   ;;  %v2126_v33 = vld [vmem:[%s2571_s0 + $0x50] ss:$8 sps:$4 sm:$0xff]   ;;  %v2128_v35 = vld [vmem:[%s2571_s0 + $0x64] ss:$8 sps:$4 sm:$0xff]  }
  0x38   :  { %v2127_v34 = vld [vmem:[%s2571_s0 + $0x150] ss:$8 sps:$4 sm:$0xff]   ;;  %v2130_v36 = vld [vmem:[%s2571_s0 + $0x164] ss:$8 sps:$4 sm:$0xff]   ;;  %v2132_v37 = vld [vmem:[%s2571_s0 + $0x60] ss:$8 sps:$4 sm:$0xff]  }
  0x39   :  { %726 = vmatmul.mubr.bf16.gmra.mrb[8].mxu0 %v2108_v21  ;;  %854 = vmatmul.mubr.bf16.gmra.mrb[8].mxu1 %v2109_v22  ;;  %v2133_v38 = vld [vmem:[%s2571_s0 + $0x160] ss:$8 sps:$4 sm:$0xff]   ;;  %v2134_v39 = vld [vmem:[%s2571_s0 + $0x74] ss:$8 sps:$4 sm:$0xff]   ;;  %v2138_v41 = vld [vmem:[%s2571_s0 + $0x70] ss:$8 sps:$4 sm:$0xff]  }
  0x3a   :  { %1709 = vmatprep.mubr.msk.bf16.mxu0 %vm580_vm0, %v2110_v23  ;;  %1725 = vmatprep.mubr.msk.bf16.mxu1 %vm580_vm0, %v2112_v24  ;;  %v2136_v40 = vld [vmem:[%s2571_s0 + $0x174] ss:$8 sps:$4 sm:$0xff]   ;;  %v2139_v42 = vld [vmem:[%s2571_s0 + $0x170] ss:$8 sps:$4 sm:$0xff]   ;;  %v2140_v43 = vld [vmem:[%s2571_s0 + $0x84] ss:$8 sps:$4 sm:$0xff]  }
  0x3b   :  { %v2142_v44 = vld [vmem:[%s2571_s0 + $0x184] ss:$8 sps:$4 sm:$0xff]   ;;  %v2144_v45 = vld [vmem:[%s2571_s0 + $0x80] ss:$8 sps:$4 sm:$0xff]   ;;  %v2146_v47 = vld [vmem:[%s2571_s0 + $0x94] ss:$8 sps:$4 sm:$0xff]  }
  0x3c   :  { %v2145_v46 = vld [vmem:[%s2571_s0 + $0x180] ss:$8 sps:$4 sm:$0xff]   ;;  %v2148_v48 = vld [vmem:[%s2571_s0 + $0x194] ss:$8 sps:$4 sm:$0xff]   ;;  %v2150_v49 = vld [vmem:[%s2571_s0 + $0x90] ss:$8 sps:$4 sm:$0xff]  }
  0x3d   :  { %v2151_v50 = vld [vmem:[%s2571_s0 + $0x190] ss:$8 sps:$4 sm:$0xff]   ;;  %v2152_v51 = vld [vmem:[%s2571_s0 + $0xa4] ss:$8 sps:$4 sm:$0xff]   ;;  %v2156_v53 = vld [vmem:[%s2571_s0 + $0xa0] ss:$8 sps:$4 sm:$0xff]  }
  0x3e   :  { %v2154_v52 = vld [vmem:[%s2571_s0 + $0x1a4] ss:$8 sps:$4 sm:$0xff]   ;;  %v2157_v54 = vld [vmem:[%s2571_s0 + $0x1a0] ss:$8 sps:$4 sm:$0xff]   ;;  %v2158_v55 = vld [vmem:[%s2571_s0 + $0xb4] ss:$8 sps:$4 sm:$0xff]  }
  0x3f   :  { %v2160_v56 = vld [vmem:[%s2571_s0 + $0x1b4] ss:$8 sps:$4 sm:$0xff]   ;;  %v2162_v57 = vld [vmem:[%s2571_s0 + $0xb0] ss:$8 sps:$4 sm:$0xff]   ;;  %v2164_v59 = vld [vmem:[%s2571_s0 + $0xc4] ss:$8 sps:$4 sm:$0xff]  }
  0x40   :  { %v2163_v58 = vld [vmem:[%s2571_s0 + $0x1b0] ss:$8 sps:$4 sm:$0xff]   ;;  %v2166_v60 = vld [vmem:[%s2571_s0 + $0x1c4] ss:$8 sps:$4 sm:$0xff]   ;;  %v2168_v61 = vld [vmem:[%s2571_s0 + $0xc0] ss:$8 sps:$4 sm:$0xff]  }
  0x41   :  { %734 = vmatmul.mubr.bf16.gmra.mrb[12].mxu0 %v2114_v25  ;;  %862 = vmatmul.mubr.bf16.gmra.mrb[12].mxu1 %v2115_v26  ;;  %v2169_v62 = vld [vmem:[%s2571_s0 + $0x1c0] ss:$8 sps:$4 sm:$0xff]   ;;  %v2170_v63 = vld [vmem:[%s2571_s0 + $0xd4] ss:$8 sps:$4 sm:$0xff]   ;;  %v2174_v1 = vld [vmem:[%s2571_s0 + $0xd0] ss:$8 sps:$4 sm:$0xff]  }
  0x42   :  { %1710 = vmatprep.mubr.msk.bf16.mxu0 %vm580_vm0, %v2116_v27  ;;  %1726 = vmatprep.mubr.msk.bf16.mxu1 %vm580_vm0, %v2118_v28  ;;  %v2172_v0 = vld [vmem:[%s2571_s0 + $0x1d4] ss:$8 sps:$4 sm:$0xff]   ;;  %v2175_v2 = vld [vmem:[%s2571_s0 + $0x1d0] ss:$8 sps:$4 sm:$0xff]   ;;  %v2176_v3 = vld [vmem:[%s2571_s0 + $0xe4] ss:$8 sps:$4 sm:$0xff]  }
  0x43   :  { %v2178_v4 = vld [vmem:[%s2571_s0 + $0x1e4] ss:$8 sps:$4 sm:$0xff]   ;;  %v2180_v5 = vld [vmem:[%s2571_s0 + $0xe0] ss:$8 sps:$4 sm:$0xff]   ;;  %v2182_v7 = vld [vmem:[%s2571_s0 + $0xf4] ss:$8 sps:$4 sm:$0xff]  }
  0x44   :  { %v2181_v6 = vld [vmem:[%s2571_s0 + $0x1e0] ss:$8 sps:$4 sm:$0xff]   ;;  %v2184_v8 = vld [vmem:[%s2571_s0 + $0x1f4] ss:$8 sps:$4 sm:$0xff]   ;;  %v2186_v9 = vld [vmem:[%s2571_s0 + $0xf0] ss:$8 sps:$4 sm:$0xff]  }
  0x45   :  { %v2187_v10 = vld [vmem:[%s2571_s0 + $0x1f0] ss:$8 sps:$4 sm:$0xff]   ;;  %v2493_v11 = vld [vmem:[%s2573_s2] ss:$0 sm:$0xff]  ;;  %s2213_s0 = smov [#allocation3]  }
  0x46   :  { %s1621_s2 = sshll.u32 %s2213_s0, 4  ;;  %s1622_s2 = int_to_ptr.vmem [resolvable:$true] %s1621_s2 }
  0x47   :  { %s2188_s22 = scalar_lea.vmem %s1622_s2, 4096  ;;  %p2193_p1 = scmp.lt.s32.totalorder %s1622_s2, %s1622_s2 }
  0x48   :  { %p2189_p0 = scmp.ne.s32.totalorder %s1622_s2, %s2188_s22  ;;  %p2194_p2 = scmp.lt.s32.totalorder %s2188_s22, %s2188_s22 }
  0x49   :  { %742 = vmatmul.mubr.bf16.gmra.mrb[16].mxu0 %v2120_v29  ;;  %870 = vmatmul.mubr.bf16.gmra.mrb[16].mxu1 %v2121_v30 }
  0x4a   :  { %1711 = vmatprep.mubr.msk.bf16.mxu0 %vm580_vm0, %v2122_v31  ;;  %1727 = vmatprep.mubr.msk.bf16.mxu1 %vm580_vm0, %v2124_v32  ;;  %p2195_p3 = por %p2194_p2, %p2193_p1 }
  0x4c   :  { %p2196_p4 = pnand %p2195_p3, %p2189_p0 }
  0x51   :  { %750 = vmatmul.mubr.bf16.gmra.mrb[20].mxu0 %v2126_v33  ;;  %878 = vmatmul.mubr.bf16.gmra.mrb[20].mxu1 %v2127_v34 }
  0x52   :  { %1712 = vmatprep.mubr.msk.bf16.mxu0 %vm580_vm0, %v2128_v35  ;;  %1728 = vmatprep.mubr.msk.bf16.mxu1 %vm580_vm0, %v2130_v36 }
  0x59   :  { %758 = vmatmul.mubr.bf16.gmra.mrb[24].mxu0 %v2132_v37  ;;  %886 = vmatmul.mubr.bf16.gmra.mrb[24].mxu1 %v2133_v38 }
  0x5a   :  { %1713 = vmatprep.mubr.msk.bf16.mxu0 %vm580_vm0, %v2134_v39  ;;  %1729 = vmatprep.mubr.msk.bf16.mxu1 %vm580_vm0, %v2136_v40 }
  0x61   :  { %766 = vmatmul.mubr.bf16.gmra.mrb[28].mxu0 %v2138_v41  ;;  %894 = vmatmul.mubr.bf16.gmra.mrb[28].mxu1 %v2139_v42 }
  0x62   :  { %1714 = vmatprep.mubr.msk.bf16.mxu0 %vm580_vm0, %v2140_v43  ;;  %1730 = vmatprep.mubr.msk.bf16.mxu1 %vm580_vm0, %v2142_v44 }
  0x69   :  { %774 = vmatmul.mubr.bf16.gmra.mrb[32].mxu0 %v2144_v45  ;;  %902 = vmatmul.mubr.bf16.gmra.mrb[32].mxu1 %v2145_v46 }
  0x6a   :  { %1715 = vmatprep.mubr.msk.bf16.mxu0 %vm580_vm0, %v2146_v47  ;;  %1731 = vmatprep.mubr.msk.bf16.mxu1 %vm580_vm0, %v2148_v48 }
  0x71   :  { %782 = vmatmul.mubr.bf16.gmra.mrb[36].mxu0 %v2150_v49  ;;  %910 = vmatmul.mubr.bf16.gmra.mrb[36].mxu1 %v2151_v50 }
  0x72   :  { %1716 = vmatprep.mubr.msk.bf16.mxu0 %vm580_vm0, %v2152_v51  ;;  %1732 = vmatprep.mubr.msk.bf16.mxu1 %vm580_vm0, %v2154_v52 }
  0x79   :  { %790 = vmatmul.mubr.bf16.gmra.mrb[40].mxu0 %v2156_v53  ;;  %918 = vmatmul.mubr.bf16.gmra.mrb[40].mxu1 %v2157_v54 }
  0x7a   :  { %1717 = vmatprep.mubr.msk.bf16.mxu0 %vm580_vm0, %v2158_v55  ;;  %1733 = vmatprep.mubr.msk.bf16.mxu1 %vm580_vm0, %v2160_v56 }
  0x81   :  { %798 = vmatmul.mubr.bf16.gmra.mrb[44].mxu0 %v2162_v57  ;;  %926 = vmatmul.mubr.bf16.gmra.mrb[44].mxu1 %v2163_v58 }
  0x82   :  { %1718 = vmatprep.mubr.msk.bf16.mxu0 %vm580_vm0, %v2164_v59  ;;  %1734 = vmatprep.mubr.msk.bf16.mxu1 %vm580_vm0, %v2166_v60 }
  0x89   :  { %806 = vmatmul.mubr.bf16.gmra.mrb[48].mxu0 %v2168_v61  ;;  %934 = vmatmul.mubr.bf16.gmra.mrb[48].mxu1 %v2169_v62 }
  0x8a   :  { %1719 = vmatprep.mubr.msk.bf16.mxu0 %vm580_vm0, %v2170_v63  ;;  %1735 = vmatprep.mubr.msk.bf16.mxu1 %vm580_vm0, %v2172_v0 }
  0x91   :  { %814 = vmatmul.mubr.bf16.gmra.mrb[52].mxu0 %v2174_v1  ;;  %942 = vmatmul.mubr.bf16.gmra.mrb[52].mxu1 %v2175_v2 }
  0x92   :  { %1720 = vmatprep.mubr.msk.bf16.mxu0 %vm580_vm0, %v2176_v3  ;;  %1736 = vmatprep.mubr.msk.bf16.mxu1 %vm580_vm0, %v2178_v4 }
  0x99   :  { %822 = vmatmul.mubr.bf16.gmra.mrb[56].mxu0 %v2180_v5  ;;  %950 = vmatmul.mubr.bf16.gmra.mrb[56].mxu1 %v2181_v6 }
  0x9a   :  { %1721 = vmatprep.mubr.msk.bf16.mxu0 %vm580_vm0, %v2182_v7  ;;  %1737 = vmatprep.mubr.msk.bf16.mxu1 %vm580_vm0, %v2184_v8 }
  0xa1   :  { %830 = vmatmul.mubr.bf16.gmra.mrb[60].mxu0 %v2186_v9  ;;  %958 = vmatmul.mubr.bf16.gmra.mrb[60].mxu1 %v2187_v10 }
  0xfc   :  { %v711_v12 = vpop.f32.mrb[0].mxu0  ;;  %v839_v13 = vpop.f32.mrb[0].mxu1 }
  0xfd   :  { %v1168_v14 = vadd.f32 %v2493_v11, %v711_v12  ;;  %v1200_v15 = vadd.f32 %v2493_v11, %v839_v13  ;;  %v713_v16 = vpop.f32.mrb[1].mxu0  ;;  %v841_v17 = vpop.f32.mrb[1].mxu1 }
  0xfe   :  { %v714_v18 = vpop.f32.mrb[2].mxu0  ;;  %v842_v19 = vpop.f32.mrb[2].mxu1 }
  0xff   :  { %v1169_v20 = vadd.f32 %v2493_v11, %v714_v18  ;;  %v1201_v21 = vadd.f32 %v2493_v11, %v842_v19  ;;  %v716_v22 = vpop.f32.mrb[3].mxu0  ;;  %v844_v23 = vpop.f32.mrb[3].mxu1  ;;  %v1232_v24 = vmax.f32 %v1168_v14, 0.0  ;;  %v1264_v25 = vmax.f32 %v1200_v15, 0.0 }
 0x101   :  { %v1233_v26 = vmax.f32 %v1169_v20, 0.0  ;;  %v1265_v27 = vmax.f32 %v1201_v21, 0.0 }
 0x103   :  { %v1870_v28 = vpack.c.bf16 %v1233_v26, %v1232_v24  ;;  %v1950_v29 = vpack.c.bf16 %v1265_v27, %v1264_v25 }
 0x104   :  { %v719_v30 = vpop.f32.mrb[4].mxu0  ;;  %v847_v31 = vpop.f32.mrb[4].mxu1 }
 0x105   :  { %1871 = vst [vmem:[#allocation3] sm:$0xff] %v1870_v28   ;;  %2042 = vst [vmem:[#allocation3 + $0x80] sm:$0xff] %v1950_v29   ;;  %v1170_v32 = vadd.f32 %v2493_v11, %v719_v30  ;;  %v1202_v33 = vadd.f32 %v2493_v11, %v847_v31  ;;  %v721_v34 = vpop.f32.mrb[5].mxu0  ;;  %v849_v35 = vpop.f32.mrb[5].mxu1 }
 0x106   :  { %v722_v36 = vpop.f32.mrb[6].mxu0  ;;  %v850_v37 = vpop.f32.mrb[6].mxu1 }
 0x107   :  { %v1171_v38 = vadd.f32 %v2493_v11, %v722_v36  ;;  %v1203_v39 = vadd.f32 %v2493_v11, %v850_v37  ;;  %v724_v40 = vpop.f32.mrb[7].mxu0  ;;  %v852_v41 = vpop.f32.mrb[7].mxu1  ;;  %v1234_v42 = vmax.f32 %v1170_v32, 0.0  ;;  %v1266_v43 = vmax.f32 %v1202_v33, 0.0 }
 0x109   :  { %v1235_v44 = vmax.f32 %v1171_v38, 0.0  ;;  %v1267_v45 = vmax.f32 %v1203_v39, 0.0 }
 0x10b   :  { %v1875_v46 = vpack.c.bf16 %v1235_v44, %v1234_v42  ;;  %v1955_v47 = vpack.c.bf16 %v1267_v45, %v1266_v43 }
 0x10c   :  { %v727_v48 = vpop.f32.mrb[8].mxu0  ;;  %v855_v49 = vpop.f32.mrb[8].mxu1 }
 0x10d   :  { %2027 = vst [vmem:[#allocation3 + $0x8] sm:$0xff] %v1875_v46   ;;  %2043 = vst [vmem:[#allocation3 + $0x88] sm:$0xff] %v1955_v47   ;;  %v1172_v50 = vadd.f32 %v2493_v11, %v727_v48  ;;  %v1204_v51 = vadd.f32 %v2493_v11, %v855_v49  ;;  %v729_v52 = vpop.f32.mrb[9].mxu0  ;;  %v857_v53 = vpop.f32.mrb[9].mxu1 }
 0x10e   :  { %v730_v54 = vpop.f32.mrb[10].mxu0  ;;  %v858_v55 = vpop.f32.mrb[10].mxu1 }
 0x10f   :  { %v1173_v56 = vadd.f32 %v2493_v11, %v730_v54  ;;  %v1205_v57 = vadd.f32 %v2493_v11, %v858_v55  ;;  %v732_v58 = vpop.f32.mrb[11].mxu0  ;;  %v860_v59 = vpop.f32.mrb[11].mxu1  ;;  %v1236_v60 = vmax.f32 %v1172_v50, 0.0  ;;  %v1268_v61 = vmax.f32 %v1204_v51, 0.0 }
 0x111   :  { %v1237_v62 = vmax.f32 %v1173_v56, 0.0  ;;  %v1269_v63 = vmax.f32 %v1205_v57, 0.0 }
 0x113   :  { %v1880_v0 = vpack.c.bf16 %v1237_v62, %v1236_v60  ;;  %v1960_v1 = vpack.c.bf16 %v1269_v63, %v1268_v61 }
 0x114   :  { %v735_v2 = vpop.f32.mrb[12].mxu0  ;;  %v863_v3 = vpop.f32.mrb[12].mxu1 }
 0x115   :  { %2028 = vst [vmem:[#allocation3 + $0x10] sm:$0xff] %v1880_v0   ;;  %2044 = vst [vmem:[#allocation3 + $0x90] sm:$0xff] %v1960_v1   ;;  %v1174_v4 = vadd.f32 %v2493_v11, %v735_v2  ;;  %v1206_v5 = vadd.f32 %v2493_v11, %v863_v3  ;;  %v737_v6 = vpop.f32.mrb[13].mxu0  ;;  %v865_v7 = vpop.f32.mrb[13].mxu1 }
 0x116   :  { %v738_v8 = vpop.f32.mrb[14].mxu0  ;;  %v866_v9 = vpop.f32.mrb[14].mxu1 }
 0x117   :  { %v1175_v10 = vadd.f32 %v2493_v11, %v738_v8  ;;  %v1207_v12 = vadd.f32 %v2493_v11, %v866_v9  ;;  %v740_v13 = vpop.f32.mrb[15].mxu0  ;;  %v868_v14 = vpop.f32.mrb[15].mxu1  ;;  %v1238_v15 = vmax.f32 %v1174_v4, 0.0  ;;  %v1270_v16 = vmax.f32 %v1206_v5, 0.0 }
 0x119   :  { %v1239_v17 = vmax.f32 %v1175_v10, 0.0  ;;  %v1271_v18 = vmax.f32 %v1207_v12, 0.0 }
 0x11b   :  { %v1885_v19 = vpack.c.bf16 %v1239_v17, %v1238_v15  ;;  %v1965_v20 = vpack.c.bf16 %v1271_v18, %v1270_v16 }
 0x11c   :  { %v743_v21 = vpop.f32.mrb[16].mxu0  ;;  %v871_v22 = vpop.f32.mrb[16].mxu1 }
 0x11d   :  { %2029 = vst [vmem:[#allocation3 + $0x18] sm:$0xff] %v1885_v19   ;;  %2045 = vst [vmem:[#allocation3 + $0x98] sm:$0xff] %v1965_v20   ;;  %v1176_v23 = vadd.f32 %v2493_v11, %v743_v21  ;;  %v1208_v24 = vadd.f32 %v2493_v11, %v871_v22  ;;  %v745_v25 = vpop.f32.mrb[17].mxu0  ;;  %v873_v26 = vpop.f32.mrb[17].mxu1 }
 0x11e   :  { %v746_v27 = vpop.f32.mrb[18].mxu0  ;;  %v874_v28 = vpop.f32.mrb[18].mxu1 }
 0x11f   :  { %v1177_v29 = vadd.f32 %v2493_v11, %v746_v27  ;;  %v1209_v30 = vadd.f32 %v2493_v11, %v874_v28  ;;  %v748_v31 = vpop.f32.mrb[19].mxu0  ;;  %v876_v32 = vpop.f32.mrb[19].mxu1  ;;  %v1240_v33 = vmax.f32 %v1176_v23, 0.0  ;;  %v1272_v34 = vmax.f32 %v1208_v24, 0.0 }
 0x121   :  { %v1241_v35 = vmax.f32 %v1177_v29, 0.0  ;;  %v1273_v36 = vmax.f32 %v1209_v30, 0.0 }
 0x123   :  { %v1890_v37 = vpack.c.bf16 %v1241_v35, %v1240_v33  ;;  %v1970_v38 = vpack.c.bf16 %v1273_v36, %v1272_v34 }
 0x124   :  { %v751_v39 = vpop.f32.mrb[20].mxu0  ;;  %v879_v40 = vpop.f32.mrb[20].mxu1 }
 0x125   :  { %2030 = vst [vmem:[#allocation3 + $0x20] sm:$0xff] %v1890_v37   ;;  %2046 = vst [vmem:[#allocation3 + $0xa0] sm:$0xff] %v1970_v38   ;;  %v1178_v41 = vadd.f32 %v2493_v11, %v751_v39  ;;  %v1210_v42 = vadd.f32 %v2493_v11, %v879_v40  ;;  %v753_v43 = vpop.f32.mrb[21].mxu0  ;;  %v881_v44 = vpop.f32.mrb[21].mxu1 }
 0x126   :  { %v754_v45 = vpop.f32.mrb[22].mxu0  ;;  %v882_v46 = vpop.f32.mrb[22].mxu1 }
 0x127   :  { %v1179_v47 = vadd.f32 %v2493_v11, %v754_v45  ;;  %v1211_v48 = vadd.f32 %v2493_v11, %v882_v46  ;;  %v756_v49 = vpop.f32.mrb[23].mxu0  ;;  %v884_v50 = vpop.f32.mrb[23].mxu1  ;;  %v1242_v51 = vmax.f32 %v1178_v41, 0.0  ;;  %v1274_v52 = vmax.f32 %v1210_v42, 0.0 }
 0x129   :  { %v1243_v53 = vmax.f32 %v1179_v47, 0.0  ;;  %v1275_v54 = vmax.f32 %v1211_v48, 0.0 }
 0x12b   :  { %v1895_v55 = vpack.c.bf16 %v1243_v53, %v1242_v51  ;;  %v1975_v56 = vpack.c.bf16 %v1275_v54, %v1274_v52 }
 0x12c   :  { %v759_v57 = vpop.f32.mrb[24].mxu0  ;;  %v887_v58 = vpop.f32.mrb[24].mxu1 }
 0x12d   :  { %2031 = vst [vmem:[#allocation3 + $0x28] sm:$0xff] %v1895_v55   ;;  %2047 = vst [vmem:[#allocation3 + $0xa8] sm:$0xff] %v1975_v56   ;;  %v1180_v59 = vadd.f32 %v2493_v11, %v759_v57  ;;  %v1212_v60 = vadd.f32 %v2493_v11, %v887_v58  ;;  %v761_v61 = vpop.f32.mrb[25].mxu0  ;;  %v889_v62 = vpop.f32.mrb[25].mxu1 }
 0x12e   :  { %v762_v63 = vpop.f32.mrb[26].mxu0  ;;  %v890_v0 = vpop.f32.mrb[26].mxu1 }
 0x12f   :  { %v1181_v1 = vadd.f32 %v2493_v11, %v762_v63  ;;  %v1213_v2 = vadd.f32 %v2493_v11, %v890_v0  ;;  %v764_v3 = vpop.f32.mrb[27].mxu0  ;;  %v892_v4 = vpop.f32.mrb[27].mxu1  ;;  %v1244_v5 = vmax.f32 %v1180_v59, 0.0  ;;  %v1276_v6 = vmax.f32 %v1212_v60, 0.0 }
 0x131   :  { %v1245_v7 = vmax.f32 %v1181_v1, 0.0  ;;  %v1277_v8 = vmax.f32 %v1213_v2, 0.0 }
 0x133   :  { %v1900_v9 = vpack.c.bf16 %v1245_v7, %v1244_v5  ;;  %v1980_v10 = vpack.c.bf16 %v1277_v8, %v1276_v6 }
 0x134   :  { %v767_v12 = vpop.f32.mrb[28].mxu0  ;;  %v895_v13 = vpop.f32.mrb[28].mxu1 }
 0x135   :  { %2032 = vst [vmem:[#allocation3 + $0x30] sm:$0xff] %v1900_v9   ;;  %2048 = vst [vmem:[#allocation3 + $0xb0] sm:$0xff] %v1980_v10   ;;  %v1182_v14 = vadd.f32 %v2493_v11, %v767_v12  ;;  %v1214_v15 = vadd.f32 %v2493_v11, %v895_v13  ;;  %v769_v16 = vpop.f32.mrb[29].mxu0  ;;  %v897_v17 = vpop.f32.mrb[29].mxu1 }
 0x136   :  { %v770_v18 = vpop.f32.mrb[30].mxu0  ;;  %v898_v19 = vpop.f32.mrb[30].mxu1 }
 0x137   :  { %v1183_v20 = vadd.f32 %v2493_v11, %v770_v18  ;;  %v1215_v21 = vadd.f32 %v2493_v11, %v898_v19  ;;  %v772_v22 = vpop.f32.mrb[31].mxu0  ;;  %v900_v23 = vpop.f32.mrb[31].mxu1  ;;  %v1246_v24 = vmax.f32 %v1182_v14, 0.0  ;;  %v1278_v25 = vmax.f32 %v1214_v15, 0.0 }
 0x139   :  { %v1247_v26 = vmax.f32 %v1183_v20, 0.0  ;;  %v1279_v27 = vmax.f32 %v1215_v21, 0.0 }
 0x13b   :  { %v1905_v28 = vpack.c.bf16 %v1247_v26, %v1246_v24  ;;  %v1985_v29 = vpack.c.bf16 %v1279_v27, %v1278_v25 }
 0x13c   :  { %v775_v30 = vpop.f32.mrb[32].mxu0  ;;  %v903_v31 = vpop.f32.mrb[32].mxu1 }
 0x13d   :  { %2033 = vst [vmem:[#allocation3 + $0x38] sm:$0xff] %v1905_v28   ;;  %2049 = vst [vmem:[#allocation3 + $0xb8] sm:$0xff] %v1985_v29   ;;  %v1184_v32 = vadd.f32 %v2493_v11, %v775_v30  ;;  %v1216_v33 = vadd.f32 %v2493_v11, %v903_v31  ;;  %v777_v34 = vpop.f32.mrb[33].mxu0  ;;  %v905_v35 = vpop.f32.mrb[33].mxu1 }
 0x13e   :  { %v778_v36 = vpop.f32.mrb[34].mxu0  ;;  %v906_v37 = vpop.f32.mrb[34].mxu1 }
 0x13f   :  { %v1185_v38 = vadd.f32 %v2493_v11, %v778_v36  ;;  %v1217_v39 = vadd.f32 %v2493_v11, %v906_v37  ;;  %v780_v40 = vpop.f32.mrb[35].mxu0  ;;  %v908_v41 = vpop.f32.mrb[35].mxu1  ;;  %v1248_v42 = vmax.f32 %v1184_v32, 0.0  ;;  %v1280_v43 = vmax.f32 %v1216_v33, 0.0 }
 0x141   :  { %v1249_v44 = vmax.f32 %v1185_v38, 0.0  ;;  %v1281_v45 = vmax.f32 %v1217_v39, 0.0 }
 0x143   :  { %v1910_v46 = vpack.c.bf16 %v1249_v44, %v1248_v42  ;;  %v1990_v47 = vpack.c.bf16 %v1281_v45, %v1280_v43 }
 0x144   :  { %v783_v48 = vpop.f32.mrb[36].mxu0  ;;  %v911_v49 = vpop.f32.mrb[36].mxu1 }
 0x145   :  { %2034 = vst [vmem:[#allocation3 + $0x40] sm:$0xff] %v1910_v46   ;;  %2050 = vst [vmem:[#allocation3 + $0xc0] sm:$0xff] %v1990_v47   ;;  %v1186_v50 = vadd.f32 %v2493_v11, %v783_v48  ;;  %v1218_v51 = vadd.f32 %v2493_v11, %v911_v49  ;;  %v785_v52 = vpop.f32.mrb[37].mxu0  ;;  %v913_v53 = vpop.f32.mrb[37].mxu1 }
 0x146   :  { %v786_v54 = vpop.f32.mrb[38].mxu0  ;;  %v914_v55 = vpop.f32.mrb[38].mxu1 }
 0x147   :  { %v1187_v56 = vadd.f32 %v2493_v11, %v786_v54  ;;  %v1219_v57 = vadd.f32 %v2493_v11, %v914_v55  ;;  %v788_v58 = vpop.f32.mrb[39].mxu0  ;;  %v916_v59 = vpop.f32.mrb[39].mxu1  ;;  %v1250_v60 = vmax.f32 %v1186_v50, 0.0  ;;  %v1282_v61 = vmax.f32 %v1218_v51, 0.0 }
 0x149   :  { %v1251_v62 = vmax.f32 %v1187_v56, 0.0  ;;  %v1283_v63 = vmax.f32 %v1219_v57, 0.0 }
 0x14b   :  { %v1915_v0 = vpack.c.bf16 %v1251_v62, %v1250_v60  ;;  %v1995_v1 = vpack.c.bf16 %v1283_v63, %v1282_v61 }
 0x14c   :  { %v791_v2 = vpop.f32.mrb[40].mxu0  ;;  %v919_v3 = vpop.f32.mrb[40].mxu1 }
 0x14d   :  { %2035 = vst [vmem:[#allocation3 + $0x48] sm:$0xff] %v1915_v0   ;;  %2051 = vst [vmem:[#allocation3 + $0xc8] sm:$0xff] %v1995_v1   ;;  %v1188_v4 = vadd.f32 %v2493_v11, %v791_v2  ;;  %v1220_v5 = vadd.f32 %v2493_v11, %v919_v3  ;;  %v793_v6 = vpop.f32.mrb[41].mxu0  ;;  %v921_v7 = vpop.f32.mrb[41].mxu1 }
 0x14e   :  { %v794_v8 = vpop.f32.mrb[42].mxu0  ;;  %v922_v9 = vpop.f32.mrb[42].mxu1 }
 0x14f   :  { %v1189_v10 = vadd.f32 %v2493_v11, %v794_v8  ;;  %v1221_v12 = vadd.f32 %v2493_v11, %v922_v9  ;;  %v796_v13 = vpop.f32.mrb[43].mxu0  ;;  %v924_v14 = vpop.f32.mrb[43].mxu1  ;;  %v1252_v15 = vmax.f32 %v1188_v4, 0.0  ;;  %v1284_v16 = vmax.f32 %v1220_v5, 0.0 }
 0x151   :  { %v1253_v17 = vmax.f32 %v1189_v10, 0.0  ;;  %v1285_v18 = vmax.f32 %v1221_v12, 0.0 }
 0x153   :  { %v1920_v19 = vpack.c.bf16 %v1253_v17, %v1252_v15  ;;  %v2000_v20 = vpack.c.bf16 %v1285_v18, %v1284_v16 }
 0x154   :  { %v799_v21 = vpop.f32.mrb[44].mxu0  ;;  %v927_v22 = vpop.f32.mrb[44].mxu1 }
 0x155   :  { %2036 = vst [vmem:[#allocation3 + $0x50] sm:$0xff] %v1920_v19   ;;  %2052 = vst [vmem:[#allocation3 + $0xd0] sm:$0xff] %v2000_v20   ;;  %v1190_v23 = vadd.f32 %v2493_v11, %v799_v21  ;;  %v1222_v24 = vadd.f32 %v2493_v11, %v927_v22  ;;  %v801_v25 = vpop.f32.mrb[45].mxu0  ;;  %v929_v26 = vpop.f32.mrb[45].mxu1 }
 0x156   :  { %v802_v27 = vpop.f32.mrb[46].mxu0  ;;  %v930_v28 = vpop.f32.mrb[46].mxu1 }
 0x157   :  { %v1191_v29 = vadd.f32 %v2493_v11, %v802_v27  ;;  %v1223_v30 = vadd.f32 %v2493_v11, %v930_v28  ;;  %v804_v31 = vpop.f32.mrb[47].mxu0  ;;  %v932_v32 = vpop.f32.mrb[47].mxu1  ;;  %v1254_v33 = vmax.f32 %v1190_v23, 0.0  ;;  %v1286_v34 = vmax.f32 %v1222_v24, 0.0 }
 0x159   :  { %v1255_v35 = vmax.f32 %v1191_v29, 0.0  ;;  %v1287_v36 = vmax.f32 %v1223_v30, 0.0 }
 0x15b   :  { %v1925_v37 = vpack.c.bf16 %v1255_v35, %v1254_v33  ;;  %v2005_v38 = vpack.c.bf16 %v1287_v36, %v1286_v34 }
 0x15c   :  { %v807_v39 = vpop.f32.mrb[48].mxu0  ;;  %v935_v40 = vpop.f32.mrb[48].mxu1 }
 0x15d   :  { %2037 = vst [vmem:[#allocation3 + $0x58] sm:$0xff] %v1925_v37   ;;  %2053 = vst [vmem:[#allocation3 + $0xd8] sm:$0xff] %v2005_v38   ;;  %v1192_v41 = vadd.f32 %v2493_v11, %v807_v39  ;;  %v1224_v42 = vadd.f32 %v2493_v11, %v935_v40  ;;  %v809_v43 = vpop.f32.mrb[49].mxu0  ;;  %v937_v44 = vpop.f32.mrb[49].mxu1 }
 0x15e   :  { %v810_v45 = vpop.f32.mrb[50].mxu0  ;;  %v938_v46 = vpop.f32.mrb[50].mxu1 }
 0x15f   :  { %v1193_v47 = vadd.f32 %v2493_v11, %v810_v45  ;;  %v1225_v48 = vadd.f32 %v2493_v11, %v938_v46  ;;  %v812_v49 = vpop.f32.mrb[51].mxu0  ;;  %v940_v50 = vpop.f32.mrb[51].mxu1  ;;  %v1256_v51 = vmax.f32 %v1192_v41, 0.0  ;;  %v1288_v52 = vmax.f32 %v1224_v42, 0.0 }
 0x161   :  { %v1257_v53 = vmax.f32 %v1193_v47, 0.0  ;;  %v1289_v54 = vmax.f32 %v1225_v48, 0.0 }
 0x163   :  { %v1930_v55 = vpack.c.bf16 %v1257_v53, %v1256_v51  ;;  %v2010_v56 = vpack.c.bf16 %v1289_v54, %v1288_v52 }
 0x164   :  { %v815_v57 = vpop.f32.mrb[52].mxu0  ;;  %v943_v58 = vpop.f32.mrb[52].mxu1 }
 0x165   :  { %2038 = vst [vmem:[#allocation3 + $0x60] sm:$0xff] %v1930_v55   ;;  %2054 = vst [vmem:[#allocation3 + $0xe0] sm:$0xff] %v2010_v56   ;;  %v1194_v59 = vadd.f32 %v2493_v11, %v815_v57  ;;  %v1226_v60 = vadd.f32 %v2493_v11, %v943_v58  ;;  %v817_v61 = vpop.f32.mrb[53].mxu0  ;;  %v945_v62 = vpop.f32.mrb[53].mxu1 }
 0x166   :  { %v818_v63 = vpop.f32.mrb[54].mxu0  ;;  %v946_v0 = vpop.f32.mrb[54].mxu1 }
 0x167   :  { %v1195_v1 = vadd.f32 %v2493_v11, %v818_v63  ;;  %v1227_v2 = vadd.f32 %v2493_v11, %v946_v0  ;;  %v820_v3 = vpop.f32.mrb[55].mxu0  ;;  %v948_v4 = vpop.f32.mrb[55].mxu1  ;;  %v1258_v5 = vmax.f32 %v1194_v59, 0.0  ;;  %v1290_v6 = vmax.f32 %v1226_v60, 0.0 }
 0x169   :  { %v1259_v7 = vmax.f32 %v1195_v1, 0.0  ;;  %v1291_v8 = vmax.f32 %v1227_v2, 0.0 }
 0x16b   :  { %v1935_v9 = vpack.c.bf16 %v1259_v7, %v1258_v5  ;;  %v2015_v10 = vpack.c.bf16 %v1291_v8, %v1290_v6 }
 0x16c   :  { %v823_v12 = vpop.f32.mrb[56].mxu0  ;;  %v951_v13 = vpop.f32.mrb[56].mxu1 }
 0x16d   :  { %2039 = vst [vmem:[#allocation3 + $0x68] sm:$0xff] %v1935_v9   ;;  %2055 = vst [vmem:[#allocation3 + $0xe8] sm:$0xff] %v2015_v10   ;;  %v1196_v14 = vadd.f32 %v2493_v11, %v823_v12  ;;  %v1228_v15 = vadd.f32 %v2493_v11, %v951_v13  ;;  %v825_v16 = vpop.f32.mrb[57].mxu0  ;;  %v953_v17 = vpop.f32.mrb[57].mxu1 }
 0x16e   :  { %v826_v18 = vpop.f32.mrb[58].mxu0  ;;  %v954_v19 = vpop.f32.mrb[58].mxu1 }
 0x16f   :  { %v1197_v20 = vadd.f32 %v2493_v11, %v826_v18  ;;  %v1229_v21 = vadd.f32 %v2493_v11, %v954_v19  ;;  %v828_v22 = vpop.f32.mrb[59].mxu0  ;;  %v956_v23 = vpop.f32.mrb[59].mxu1  ;;  %v1260_v24 = vmax.f32 %v1196_v14, 0.0  ;;  %v1292_v25 = vmax.f32 %v1228_v15, 0.0 }
 0x171   :  { %v1261_v26 = vmax.f32 %v1197_v20, 0.0  ;;  %v1293_v27 = vmax.f32 %v1229_v21, 0.0 }
 0x173   :  { %v1940_v28 = vpack.c.bf16 %v1261_v26, %v1260_v24  ;;  %v2020_v29 = vpack.c.bf16 %v1293_v27, %v1292_v25 }
 0x174   :  { %v831_v30 = vpop.f32.mrb[60].mxu0  ;;  %v959_v31 = vpop.f32.mrb[60].mxu1 }
 0x175   :  { %2040 = vst [vmem:[#allocation3 + $0x70] sm:$0xff] %v1940_v28   ;;  %2056 = vst [vmem:[#allocation3 + $0xf0] sm:$0xff] %v2020_v29   ;;  %v1198_v32 = vadd.f32 %v2493_v11, %v831_v30  ;;  %v1230_v33 = vadd.f32 %v2493_v11, %v959_v31  ;;  %v833_v34 = vpop.f32.mrb[61].mxu0  ;;  %v961_v35 = vpop.f32.mrb[61].mxu1 }
 0x176   :  { %v834_v36 = vpop.f32.mrb[62].mxu0  ;;  %v962_v37 = vpop.f32.mrb[62].mxu1 }
 0x177   :  { %v1199_v38 = vadd.f32 %v2493_v11, %v834_v36  ;;  %v1231_v39 = vadd.f32 %v2493_v11, %v962_v37  ;;  %v836_v40 = vpop.f32.mrb[63].mxu0  ;;  %v964_v41 = vpop.f32.mrb[63].mxu1  ;;  %v1262_v42 = vmax.f32 %v1198_v32, 0.0  ;;  %v1294_v43 = vmax.f32 %v1230_v33, 0.0 }
 0x179   :  { %v1263_v44 = vmax.f32 %v1199_v38, 0.0  ;;  %v1295_v45 = vmax.f32 %v1231_v39, 0.0 }
 0x17b   :  { %v1945_v46 = vpack.c.bf16 %v1263_v44, %v1262_v42  ;;  %v2025_v47 = vpack.c.bf16 %v1295_v45, %v1294_v43 }
 0x17d   :  { %2041 = vst [vmem:[#allocation3 + $0x78] sm:$0xff] %v1945_v46   ;;  %2057 = vst [vmem:[#allocation3 + $0xf8] sm:$0xff] %v2025_v47  }
 0x17e   :  { %2199 = shalt.err (!%p2196_p4)
}
 0x17f   :  { %s2200_s25 = scalar_lea.hbm %s2574_s3, 4096 }
 0x180   :  { %p2201_p5 = scmp.ne.s32.totalorder %s2574_s3, %s2200_s25  ;;  %p2204_p6 = scmp.lt.u32.totalorder %s2200_s25, %s2574_s3 }
 0x182   :  { %p2206_p7 = pnand %p2204_p6, %p2201_p5 }
 0x184   :  { %2209 = shalt.err (!%p2206_p7)
}
 0x185   :  { %s2214_s30 = smov 64   ;;  %s2215_s4 = smov 4  }
 0x186   :  { %1627 = dma.vmem_to_hbm [thread:$0]  %s1622_s2, 4096, %s2574_s3, [#allocation4], %s2214_s30, %s2214_s30, %s2215_s4  }
 0x187   :  { %2210 = dma.done.wait [#allocation4], 4096  }
 0x188   :  { %2211 = vsyncadd [#allocation4], 4294963200 }
 0x189   :  { %1631 = vsyncpa [#allocation4], 1 }

</bundles_post_ra>
